<compile_context>
chip_gen: v7x
topology: tpu7x:2x2x1
jax: 0.10.0
libtpu: 0.0.40
codegen_flags: <defaults>
</compile_context>

<pallas_src>
import jax
import jax.numpy as jnp
from jax.experimental import pallas as pl
from jax.experimental.pallas import tpu as pltpu


_LANE = 128


def _pick_tile_rows(n_rows, lane_w, itemsize, max_tile_rows=None):
    """Rows per grid step: biggest tile that fits the generation-dependent VMEM budget."""
    try:
        vmem_cap = int(pltpu.get_tpu_info().vmem_capacity_bytes)
    except Exception:  # no TPU info available -> assume the smallest (v7x: 64 MiB)
        vmem_cap = 64 * 1024 * 1024
    # Explicit scoped-VMEM limit (default scoped limit is well below physical).
    vmem_limit = min((vmem_cap * 3) // 4, 96 * 1024 * 1024)
    tile_budget = vmem_limit // 2  # headroom for temporaries / outputs
    # 3 inputs x 2 pipeline buffers in native dtype + ~4 f32 tile-sized temporaries.
    bytes_per_row = 3 * 2 * lane_w * itemsize + 4 * lane_w * 4
    tb = tile_budget // bytes_per_row
    tb = max(8, min(tb, 4096))
    tb = (tb // 8) * 8
    if max_tile_rows is not None:
        tb = min(tb, max(8, (int(max_tile_rows) // 8) * 8))
    if tb >= n_rows:
        tb = n_rows  # single block; block dims == full array dims is always legal
    return tb, vmem_limit


def _make_rowwise_kernel(margin, eps, tile_rows, total_rows):
    """General path: one embedding row per sublane row (lane dim == D)."""

    def kernel(a_ref, p_ref, n_ref, o_ref):
        # Upcast per tile inside the kernel (keeps HBM traffic in the input dtype).
        a = a_ref[...].astype(jnp.float32)
        p = p_ref[...].astype(jnp.float32)
        n = n_ref[...].astype(jnp.float32)
        dp = a - p + eps
        dn = a - n + eps
        dp2 = jnp.sum(dp * dp, axis=-1, keepdims=True)  # (tile_rows, 1)
        dn2 = jnp.sum(dn * dn, axis=-1, keepdims=True)
        loss = jnp.maximum(jnp.sqrt(dp2) - jnp.sqrt(dn2) + margin, 0.0)
        # Mask rows of a ragged last tile (padding would otherwise add relu(margin)).
        row = (jax.lax.broadcasted_iota(jnp.int32, loss.shape, 0)
               + pl.program_id(0) * tile_rows)
        loss = jnp.where(row < total_rows, loss, 0.0)
        # Per-tile partial sum broadcast into a full (8,128) tile -> unmasked store.
        o_ref[...] = jnp.broadcast_to(jnp.sum(loss), o_ref.shape)

    return kernel


def _make_packed_kernel(margin, eps, d, tile_rows, total_rows):
    """Lane-dense path for small D: 128 // d original rows packed per 128-lane row."""

    def kernel(a_ref, p_ref, n_ref, o_ref):
        a = a_ref[...].astype(jnp.float32)  # (tile_rows, 128)
        p = p_ref[...].astype(jnp.float32)
        n = n_ref[...].astype(jnp.float32)
        dp = a - p + eps
        dn = a - n + eps
        dp2 = dp * dp
        dn2 = dn * dn
        # Segmented (length-d) in-lane sums via XLU rotations: after log2(d) steps,
        # lane g*d + d - 1 holds the sum over its contiguous d-lane group.
        s = 1
        while s < d:
            dp2 = dp2 + pltpu.roll(dp2, shift=s, axis=1)
            dn2 = dn2 + pltpu.roll(dn2, shift=s, axis=1)
            s *= 2
        loss = jnp.maximum(jnp.sqrt(dp2) - jnp.sqrt(dn2) + margin, 0.0)
        lane = jax.lax.broadcasted_iota(jnp.int32, loss.shape, 1)
        row = (jax.lax.broadcasted_iota(jnp.int32, loss.shape, 0)
               + pl.program_id(0) * tile_rows)
        valid = jnp.logical_and(lane % d == d - 1, row < total_rows)
        loss = jnp.where(valid, loss, 0.0)
        o_ref[...] = jnp.broadcast_to(jnp.sum(loss), o_ref.shape)

    return kernel


def triplet_loss(anchor, positive, negative, margin=1.0, eps=1e-6,
                 max_tile_rows=None):
    """Mean triplet margin loss over the batch (matches the PyTorch module)."""
    assert anchor.shape == positive.shape == negative.shape
    assert anchor.ndim == 2, "expected (batch, embedding_dim) inputs"
    B, D = anchor.shape
    margin = float(margin)
    eps = float(eps)
    itemsize = jnp.dtype(anchor.dtype).itemsize

    if D < _LANE and _LANE % D == 0 and B % (_LANE // D) == 0:
        # Lane-dense packing: row-major view of (B, D) as (B*D/128, 128).
        group = _LANE // D
        n_rows = B // group
        lane_w = _LANE
        a2 = anchor.reshape(n_rows, _LANE)
        p2 = positive.reshape(n_rows, _LANE)
        n2 = negative.reshape(n_rows, _LANE)
        make_kernel = lambda tb: _make_packed_kernel(margin, eps, D, tb, n_rows)
    else:
        n_rows = B
        lane_w = D
        a2, p2, n2 = anchor, positive, negative
        make_kernel = lambda tb: _make_rowwise_kernel(margin, eps, tb, n_rows)

    tb, vmem_limit = _pick_tile_rows(n_rows, lane_w, itemsize, max_tile_rows)
    num_tiles = (n_rows + tb - 1) // tb

    partials = pl.pallas_call(
        make_kernel(tb),
        out_shape=jax.ShapeDtypeStruct((num_tiles, 8, _LANE), jnp.float32),
        grid=(num_tiles,),
        in_specs=[pl.BlockSpec((tb, lane_w), lambda i: (i, 0)) for _ in range(3)],
        out_specs=pl.BlockSpec((1, 8, _LANE), lambda i: (i, 0, 0)),
        compiler_params=pltpu.CompilerParams(
            dimension_semantics=("parallel",),
            vmem_limit_bytes=vmem_limit,
        ),
    )(a2, p2, n2)

    # Tiny final reduction + normalization by the FULL batch size.
    return jnp.sum(partials[:, 0, 0]) * (1.0 / B)


def _reference(anchor, positive, negative, margin=1.0, eps=1e-6):
    dp = jnp.sqrt(jnp.sum((anchor - positive + eps) ** 2, axis=-1))
    dn = jnp.sqrt(jnp.sum((anchor - negative + eps) ** 2, axis=-1))
    return jnp.mean(jnp.maximum(dp - dn + margin, 0.0))


if __name__ == "__main__":
    key = jax.random.PRNGKey(0)

    def check(B, D, **kw):
        k1, k2, k3 = jax.random.split(jax.random.fold_in(key, B * 1000 + D), 3)
        a = jax.random.normal(k1, (B, D), dtype=jnp.float32)
        p = jax.random.normal(k2, (B, D), dtype=jnp.float32)
        n = jax.random.normal(k3, (B, D), dtype=jnp.float32)
        got = triplet_loss(a, p, n, margin=1.0, **kw)
        jax.block_until_ready(got)
        want = _reference(a, p, n, margin=1.0)
        assert jnp.allclose(got, want, atol=1e-5, rtol=1e-5), (B, D, got, want)

    # Small embedding batch implied by the module (lane-packed path, single tile).
    check(8, 32)
    # General row-wise path with a multi-tile grid and a ragged last tile.
    check(36, 160, max_tile_rows=16)
    # Lane-packed path with a multi-tile grid and a ragged last tile.
    check(40, 32, max_tile_rows=8)

    print("KERNEL_OK")
</pallas_src>

<mosaic_0001>
module attributes {stable_mosaic.version = 11 : i64} {
  func.func @kernel(%arg0: i32, %arg1: memref<2x128xf32, #tpu.memory_space<vmem>>, %arg2: memref<2x128xf32, #tpu.memory_space<vmem>>, %arg3: memref<2x128xf32, #tpu.memory_space<vmem>>, %arg4: memref<1x8x128xf32, #tpu.memory_space<vmem>>) attributes {dimension_semantics = [#tpu.dimension_semantics<parallel>], iteration_bounds = array<i64: 1>, scalar_prefetch = 0 : i64, scratch_operands = 0 : i64, tpu.core_type = #tpu.core_type<tc>, window_params = [{transform_indices = @transform_0, window_bounds = array<i64: 2, 128>}, {transform_indices = @transform_1, window_bounds = array<i64: 2, 128>}, {transform_indices = @transform_2, window_bounds = array<i64: 2, 128>}, {transform_indices = @transform_3, window_bounds = array<i64: 1, 8, 128>}]} {
    %c0 = arith.constant 0 : index
    %c0_0 = arith.constant 0 : index
    %0 = vector.load %arg1[%c0, %c0_0] : memref<2x128xf32, #tpu.memory_space<vmem>>, vector<2x128xf32>
    %c0_1 = arith.constant 0 : index
    %c0_2 = arith.constant 0 : index
    %1 = vector.load %arg2[%c0_1, %c0_2] : memref<2x128xf32, #tpu.memory_space<vmem>>, vector<2x128xf32>
    %c0_3 = arith.constant 0 : index
    %c0_4 = arith.constant 0 : index
    %2 = vector.load %arg3[%c0_3, %c0_4] : memref<2x128xf32, #tpu.memory_space<vmem>>, vector<2x128xf32>
    %3 = arith.subf %0, %1 : vector<2x128xf32>
    %cst = arith.constant 9.99999997E-7 : f32
    %4 = vector.broadcast %cst : f32 to vector<2x128xf32>
    %5 = arith.addf %3, %4 : vector<2x128xf32>
    %6 = arith.subf %0, %2 : vector<2x128xf32>
    %cst_5 = arith.constant 9.99999997E-7 : f32
    %7 = vector.broadcast %cst_5 : f32 to vector<2x128xf32>
    %8 = arith.addf %6, %7 : vector<2x128xf32>
    %9 = arith.mulf %5, %5 : vector<2x128xf32>
    %10 = arith.mulf %8, %8 : vector<2x128xf32>
    %c1_i32 = arith.constant 1 : i32
    %11 = tpu.dynamic_rotate %9 by %c1_i32 dim 1 : vector<2x128xf32>, i32 -> vector<2x128xf32>
    %12 = arith.addf %9, %11 : vector<2x128xf32>
    %c1_i32_6 = arith.constant 1 : i32
    %13 = tpu.dynamic_rotate %10 by %c1_i32_6 dim 1 : vector<2x128xf32>, i32 -> vector<2x128xf32>
    %14 = arith.addf %10, %13 : vector<2x128xf32>
    %c2_i32 = arith.constant 2 : i32
    %15 = tpu.dynamic_rotate %12 by %c2_i32 dim 1 : vector<2x128xf32>, i32 -> vector<2x128xf32>
    %16 = arith.addf %12, %15 : vector<2x128xf32>
    %c2_i32_7 = arith.constant 2 : i32
    %17 = tpu.dynamic_rotate %14 by %c2_i32_7 dim 1 : vector<2x128xf32>, i32 -> vector<2x128xf32>
    %18 = arith.addf %14, %17 : vector<2x128xf32>
    %c4_i32 = arith.constant 4 : i32
    %19 = tpu.dynamic_rotate %16 by %c4_i32 dim 1 : vector<2x128xf32>, i32 -> vector<2x128xf32>
    %20 = arith.addf %16, %19 : vector<2x128xf32>
    %c4_i32_8 = arith.constant 4 : i32
    %21 = tpu.dynamic_rotate %18 by %c4_i32_8 dim 1 : vector<2x128xf32>, i32 -> vector<2x128xf32>
    %22 = arith.addf %18, %21 : vector<2x128xf32>
    %c8_i32 = arith.constant 8 : i32
    %23 = tpu.dynamic_rotate %20 by %c8_i32 dim 1 : vector<2x128xf32>, i32 -> vector<2x128xf32>
    %24 = arith.addf %20, %23 : vector<2x128xf32>
    %c8_i32_9 = arith.constant 8 : i32
    %25 = tpu.dynamic_rotate %22 by %c8_i32_9 dim 1 : vector<2x128xf32>, i32 -> vector<2x128xf32>
    %26 = arith.addf %22, %25 : vector<2x128xf32>
    %c16_i32 = arith.constant 16 : i32
    %27 = tpu.dynamic_rotate %24 by %c16_i32 dim 1 : vector<2x128xf32>, i32 -> vector<2x128xf32>
    %28 = arith.addf %24, %27 : vector<2x128xf32>
    %c16_i32_10 = arith.constant 16 : i32
    %29 = tpu.dynamic_rotate %26 by %c16_i32_10 dim 1 : vector<2x128xf32>, i32 -> vector<2x128xf32>
    %30 = arith.addf %26, %29 : vector<2x128xf32>
    %31 = math.sqrt %28 : vector<2x128xf32>
    %32 = math.sqrt %30 : vector<2x128xf32>
    %33 = arith.subf %31, %32 : vector<2x128xf32>
    %cst_11 = arith.constant 1.000000e+00 : f32
    %34 = vector.broadcast %cst_11 : f32 to vector<2x128xf32>
    %35 = arith.addf %33, %34 : vector<2x128xf32>
    %cst_12 = arith.constant 0.000000e+00 : f32
    %36 = vector.broadcast %cst_12 : f32 to vector<2x128xf32>
    %37 = arith.maximumf %35, %36 : vector<2x128xf32>
    %38 = tpu.iota {dimensions = array<i32: 1>} : vector<2x128xi32>
    %39 = tpu.iota {dimensions = array<i32: 0>} : vector<2x128xi32>
    %c2_i32_13 = arith.constant 2 : i32
    %40 = arith.muli %arg0, %c2_i32_13 : i32
    %41 = vector.broadcast %40 : i32 to vector<2x128xi32>
    %42 = arith.addi %39, %41 : vector<2x128xi32>
    %c32_i32 = arith.constant 32 : i32
    %c0_i32 = arith.constant 0 : i32
    %43 = arith.cmpi eq, %c32_i32, %c0_i32 : i32
    %c1_i32_14 = arith.constant 1 : i32
    %44 = arith.select %43, %c1_i32_14, %c32_i32 : i32
    %45 = vector.broadcast %44 : i32 to vector<2x128xi32>
    %46 = arith.remsi %38, %45 : vector<2x128xi32>
    %c0_i32_15 = arith.constant 0 : i32
    %47 = vector.broadcast %c0_i32_15 : i32 to vector<2x128xi32>
    %48 = arith.cmpi ne, %46, %47 : vector<2x128xi32>
    %c0_i32_16 = arith.constant 0 : i32
    %49 = vector.broadcast %c0_i32_16 : i32 to vector<2x128xi32>
    %50 = arith.cmpi slt, %46, %49 : vector<2x128xi32>
    %c0_i32_17 = arith.constant 0 : i32
    %51 = arith.cmpi slt, %44, %c0_i32_17 : i32
    %52 = vector.broadcast %51 : i1 to vector<2x128xi1>
    %53 = vector.broadcast %52 : vector<2x128xi1> to vector<2x128xi1>
    %54 = arith.xori %50, %53 : vector<2x128xi1>
    %55 = arith.andi %54, %48 : vector<2x128xi1>
    %56 = vector.broadcast %44 : i32 to vector<2x128xi32>
    %57 = arith.addi %46, %56 : vector<2x128xi32>
    %58 = arith.select %55, %57, %46 : vector<2x128xi1>, vector<2x128xi32>
    %c31_i32 = arith.constant 31 : i32
    %59 = vector.broadcast %c31_i32 : i32 to vector<2x128xi32>
    %60 = arith.cmpi eq, %58, %59 : vector<2x128xi32>
    %c2_i32_18 = arith.constant 2 : i32
    %61 = vector.broadcast %c2_i32_18 : i32 to vector<2x128xi32>
    %62 = arith.cmpi slt, %42, %61 : vector<2x128xi32>
    %63 = arith.andi %60, %62 : vector<2x128xi1>
    %cst_19 = arith.constant 0.000000e+00 : f32
    %64 = vector.broadcast %cst_19 : f32 to vector<2x128xf32>
    %65 = arith.select %63, %37, %64 : vector<2x128xi1>, vector<2x128xf32>
    %66 = vector.shape_cast %65 : vector<2x128xf32> to vector<1x2x128xf32>
    %cst_20 = arith.constant dense<0.000000e+00> : vector<1xf32>
    %67 = vector.multi_reduction <add>, %66, %cst_20 [1, 2] : vector<1x2x128xf32> to vector<1xf32>
    %68 = vector.shape_cast %67 : vector<1xf32> to vector<1x1x1xf32>
    %69 = vector.extract %68[0, 0, 0] : f32 from vector<1x1x1xf32>
    %70 = vector.broadcast %69 : f32 to vector<1x8x128xf32>
    %c0_21 = arith.constant 0 : index
    %c0_22 = arith.constant 0 : index
    %c0_23 = arith.constant 0 : index
    %71 = vector.load %arg4[%c0_21, %c0_22, %c0_23] : memref<1x8x128xf32, #tpu.memory_space<vmem>>, vector<1x8x128xf32>
    tpu.vector_store %arg4[%c0_21, %c0_22, %c0_23], %70 {strides = array<i32>} : memref<1x8x128xf32, #tpu.memory_space<vmem>>, vector<1x8x128xf32>,
    return
  }
  func.func @transform_0(%arg0: i32) -> (i32, i32) {
    %c0_i32 = arith.constant 0 : i32
    %c0_i32_0 = arith.constant 0 : i32
    return %arg0, %c0_i32 : i32, i32
  }
  func.func @transform_1(%arg0: i32) -> (i32, i32) {
    %c0_i32 = arith.constant 0 : i32
    %c0_i32_0 = arith.constant 0 : i32
    return %arg0, %c0_i32 : i32, i32
  }
  func.func @transform_2(%arg0: i32) -> (i32, i32) {
    %c0_i32 = arith.constant 0 : i32
    %c0_i32_0 = arith.constant 0 : i32
    return %arg0, %c0_i32 : i32, i32
  }
  func.func @transform_3(%arg0: i32) -> (i32, i32, i32) {
    %c0_i32 = arith.constant 0 : i32
    %c0_i32_0 = arith.constant 0 : i32
    %c0_i32_1 = arith.constant 0 : i32
    return %arg0, %c0_i32, %c0_i32_0 : i32, i32, i32
  }
}

</mosaic_0001>

<bundles_post_ra>
// kernel: tpu_custom_call.1
= control target key start
LH: loop header
LB: loop body
LE: loop exit
PB: predicated region body
PF: predicated region fallthrough
CT: control target
= control target key end

     0   :  { %8 = vsyncpa [#allocation3], 0  ;;  %s252_s0 = inlined_call_operand.hbm [shape: f32[2,128], index: 0, kind: input, shape index: {}]   ;;  %s253_s1 = inlined_call_operand.vmem [shape: f32[2,128], index: 1, kind: input, shape index: {}]   ;;  %s254_s2 = inlined_call_operand.vmem [shape: f32[2,128], index: 2, kind: input, shape index: {}]   ;;  %s255_s3 = inlined_call_operand.hbm [shape: f32[1,8,128], index: 3, kind: output, shape index: {}]  }
   0x1   :  { %9 = vsyncpa [#allocation4], 0  ;;  %s195_s12 = smov [#allocation2]   ;;  %s147_s16 = scalar_lea.hbm %s252_s0, 32 }
   0x2   :  { %s16_s13 = sshll.u32 %s195_s12, 4  ;;  %p148_p0 = scmp.ne.s32.totalorder %s252_s0, %s147_s16  ;;  %s17_s13 = int_to_ptr.vmem [resolvable:$true] %s16_s13 }
   0x3   :  { %p151_p1 = scmp.lt.u32.totalorder %s147_s16, %s252_s0 }
   0x5   :  { %p153_p2 = pnand %p151_p1, %p148_p0 }
   0x7   :  { %156 = shalt.err (!%p153_p2)
}
   0x8   :  { %s157_s21 = scalar_lea.vmem %s17_s13, 32  ;;  %p162_p4 = scmp.lt.s32.totalorder %s17_s13, %s17_s13 }
   0x9   :  { %p158_p3 = scmp.ne.s32.totalorder %s17_s13, %s157_s21  ;;  %p163_p5 = scmp.lt.s32.totalorder %s157_s21, %s157_s21 }
   0xb   :  { %p164_p6 = por %p163_p5, %p162_p4 }
   0xd   :  { %p165_p7 = pnand %p164_p6, %p158_p3 }
   0xf   :  { %168 = shalt.err (!%p165_p7)
}
  0x10   :  { %19 = dma.hbm_to_vmem [thread:$0]  %s252_s0, 32, %s17_s13, [#allocation3]  }
  0x11   :  { %191 = dma.done.wait [#allocation3], 32  }
  0x12   :  { %192 = vsyncadd [#allocation3], 4294967264  ;;  %v27_v0 = vld [vmem:[#allocation2] sm:$0x3]  ;;  %s196_s28 = smov 1   ;;  %s197_s0 = smov 2   ;;  %v83_v29 = vlaneseq }
  0x13   :  { %v28_v1 = vld [vmem:[%s253_s1] sm:$0x3]  ;;  %s198_s1 = smov 4   ;;  %s200_s29 = smov 16   ;;  %vm106_vm7 = vcmask 1041408  }
  0x14   :  { %v29_v2 = vld [vmem:[%s254_s2] sm:$0x3]  ;;  %v30_v3 = vsub.f32 %v27_v0, %v28_v1  ;;  %s199_s2 = smov 8   ;;  %v84_v32 = vand.u32 127, %v83_v29  ;;  %v86_v36 = vshrl.u32 %v83_v29, 7  ;;  %s201_s30 = smov [#allocation5]  }
  0x15   :  { %v32_v4 = vsub.f32 %v27_v0, %v29_v2  ;;  %s125_s4 = sshll.u32 %s201_s30, 4  ;;  %s126_s4 = int_to_ptr.vmem [resolvable:$true] %s125_s4 }
  0x16   :  { %v31_v5 = vadd.f32 1e-06, %v30_v3  ;;  %v94_v37 = vand.u32 31, %v84_v32  ;;  %vm103_vm5 = vcmp.lt.s32.totalorder %v86_v36, 2  ;;  %s169_s6 = scalar_lea.vmem %s126_s4, 128  ;;  %p174_p9 = scmp.lt.s32.totalorder %s126_s4, %s126_s4 }
  0x17   :  { %v33_v6 = vadd.f32 1e-06, %v32_v4  ;;  %p170_p8 = scmp.ne.s32.totalorder %s126_s4, %s169_s6  ;;  %p175_p10 = scmp.lt.s32.totalorder %s169_s6, %s169_s6 }
  0x18   :  { %v34_v7 = vmul.f32 %v31_v5, %v31_v5  ;;  %vm102_vm4 = vcmp.eq.s32.totalorder %v94_v37, 31 }
  0x19   :  { %v35_v8 = vmul.f32 %v33_v6, %v33_v6  ;;  %vm104_vm6 = vmand %vm102_vm4, %vm103_vm5  ;;  %p176_p11 = por %p175_p10, %p174_p9 }
  0x1a   :  { %36 = vrot.lane.b32.xlu0 %v34_v7, %s196_s28 }
  0x1b   :  { %p177_p12 = pnand %p176_p11, %p170_p8 }
  0x1e   :  { %39 = vrot.lane.b32.xlu0 %v35_v8, %s196_s28 }
  0x8c   :  { %v37_v9 = vpop.permute.xlu0 %36 }
  0x8d   :  { %v38_v10 = vadd.f32 %v37_v9, %v34_v7 }
  0x8f   :  { %42 = vrot.lane.b32.xlu1 %v38_v10, %s197_s0 }
  0x90   :  { %v40_v11 = vpop.permute.xlu0 %39 }
  0x91   :  { %v41_v12 = vadd.f32 %v40_v11, %v35_v8 }
  0x93   :  { %45 = vrot.lane.b32.xlu1 %v41_v12, %s197_s0 }
 0x101   :  { %v43_v13 = vpop.permute.xlu1 %42 }
 0x102   :  { %v44_v14 = vadd.f32 %v43_v13, %v38_v10 }
 0x104   :  { %48 = vrot.lane.b32.xlu0 %v44_v14, %s198_s1 }
 0x105   :  { %v46_v15 = vpop.permute.xlu1 %45 }
 0x106   :  { %v47_v16 = vadd.f32 %v46_v15, %v41_v12 }
 0x108   :  { %51 = vrot.lane.b32.xlu1 %v47_v16, %s198_s1 }
 0x176   :  { %v49_v17 = vpop.permute.xlu0 %48 }
 0x177   :  { %v50_v18 = vadd.f32 %v49_v17, %v44_v14 }
 0x179   :  { %54 = vrot.lane.b32.xlu0 %v50_v18, %s199_s2 }
 0x17a   :  { %v52_v19 = vpop.permute.xlu1 %51 }
 0x17b   :  { %v53_v20 = vadd.f32 %v52_v19, %v47_v16 }
 0x17d   :  { %57 = vrot.lane.b32.xlu1 %v53_v20, %s199_s2 }
 0x1eb   :  { %v55_v21 = vpop.permute.xlu0 %54 }
 0x1ec   :  { %v56_v22 = vadd.f32 %v55_v21, %v50_v18 }
 0x1ee   :  { %60 = vrot.lane.b32.xlu0 %v56_v22, %s200_s29 }
 0x1ef   :  { %v58_v23 = vpop.permute.xlu1 %57 }
 0x1f0   :  { %v59_v24 = vadd.f32 %v58_v23, %v53_v20 }
 0x1f2   :  { %63 = vrot.lane.b32.xlu1 %v59_v24, %s200_s29 }
 0x260   :  { %v61_v25 = vpop.permute.xlu0 %60 }
 0x261   :  { %v62_v26 = vadd.f32 %v61_v25, %v56_v22 }
 0x263   :  { %143 = vrsqrt.f32 %v62_v26  ;;  %vm68_vm0 = vcmp.eq.f32.partialorder %v62_v26, inf  ;;  %v71_v38 = vand.u32 2147483648, %v62_v26  ;;  %vm70_vm2 = vcmp.eq.f32.partialorder %v62_v26, 0.0 }
 0x264   :  { %v64_v27 = vpop.permute.xlu1 %63 }
 0x265   :  { %v65_v28 = vadd.f32 %v64_v27, %v59_v24 }
 0x267   :  { %145 = vrsqrt.f32 %v65_v28  ;;  %vm75_vm1 = vcmp.eq.f32.partialorder %v65_v28, inf  ;;  %v78_v39 = vand.u32 2147483648, %v65_v28  ;;  %vm77_vm3 = vcmp.eq.f32.partialorder %v65_v28, 0.0 }
 0x26d   :  { %v144_v30 = vpop.eup %143 }
 0x26e   :  { %v67_v31 = vmul.f32 %v144_v30, %v62_v26 }
 0x270   :  { %v69_v34 = vsel %vm68_vm0, %v62_v26, %v67_v31 }
 0x271   :  { %v146_v33 = vpop.eup %145  ;;  %v72_v41 = vsel %vm70_vm2, %v71_v38, %v69_v34 }
 0x272   :  { %v74_v35 = vmul.f32 %v146_v33, %v65_v28 }
 0x274   :  { %v76_v40 = vsel %vm75_vm1, %v65_v28, %v74_v35 }
 0x275   :  { %v79_v42 = vsel %vm77_vm3, %v78_v39, %v76_v40 }
 0x276   :  { %v80_v43 = vsub.f32 %v72_v41, %v79_v42 }
 0x278   :  { %v81_v44 = vadd.f32 1.0, %v80_v43 }
 0x27a   :  { %v82_v45 = vmax.f32 %v81_v44, 0.0 }
 0x27c   :  { %v105_v46 = vsel %vm104_vm6, %v82_v45, 0.0 }
 0x27d   :  { %v107_v47 = vsel %vm106_vm7, %v105_v46, 0.0 }
 0x27e   :  { %108 = vadd.xlane.f32.xlu0 %v107_v47 }
 0x30b   :  { %v109_v48 = vpop.xlane.xlu0 %108 }
 0x30c   :  { %v110_v49 = vrot.slane %v109_v48, 4 }
 0x30e   :  { %v111_v50 = vadd.f32 %v110_v49, %v109_v48 }
 0x310   :  { %v112_v51 = vrot.slane %v111_v50, 2 }
 0x312   :  { %v113_v52 = vadd.f32 %v112_v51, %v111_v50 }
 0x314   :  { %v114_v53 = vrot.slane %v113_v52, 1 }
 0x316   :  { %v115_v54 = vadd.f32 %v114_v53, %v113_v52 }
 0x318   :  { %134 = vpush %v115_v54 }
 0x349   :  { %s135_s5 = spop %134 }
 0x34a   :  { %v117_v55 = vstv %s135_s5 }
 0x34b   :  { %118 = vst [vmem:[#allocation5] sm:$0xff] %v117_v55 }
 0x34c   :  { %180 = shalt.err (!%p177_p12)
}
 0x34d   :  { %s181_s9 = scalar_lea.hbm %s255_s3, 128 }
 0x34e   :  { %p182_p13 = scmp.ne.s32.totalorder %s255_s3, %s181_s9  ;;  %p185_p0 = scmp.lt.u32.totalorder %s181_s9, %s255_s3 }
 0x350   :  { %p187_p1 = pnand %p185_p0, %p182_p13 }
 0x352   :  { %190 = shalt.err (!%p187_p1)
}
 0x353   :  { %128 = dma.vmem_to_hbm [thread:$0]  %s126_s4, 128, %s255_s3, [#allocation4]  }
 0x354   :  { %193 = dma.done.wait [#allocation4], 128  }
 0x355   :  { %194 = vsyncadd [#allocation4], 4294967168 }
 0x356   :  { %132 = vsyncpa [#allocation3], 1 }
 0x357   :  { %133 = vsyncpa [#allocation4], 1 }

</bundles_post_ra>
